<compile_context>
chip_gen: v7x
topology: tpu7x:2x2x1
jax: 0.10.0
libtpu: 0.0.40
codegen_flags: <defaults>
</compile_context>

<pallas_src>
import functools

import jax
import jax.numpy as jnp
from jax.experimental import pallas as pl
from jax.experimental.pallas import tpu as pltpu


# ---------------------------------------------------------------------------
# Hardware / budgeting helpers (all guarded: any failure -> conservative value)
# ---------------------------------------------------------------------------

_FOLD_HW_THRESHOLD = 256               # fold only when HW is lane-sparse (< 2 vregs)
_FOLD_LANE_TARGET = 512                # aim for >= 4 full vregs per row after folding
_TILED_BLOCK_BYTES = 8 * 1024 * 1024   # per-block target for the two-pass path


def _vmem_capacity_bytes():
    """Physical VMEM per core (128 MiB on v5e/v6e, 64 MiB on v7x)."""
    try:
        return int(pltpu.get_tpu_info().vmem_capacity_bytes)
    except Exception:
        return 64 * 1024 * 1024        # conservative (v7x-sized) fallback


def _tensorcores_per_chip():
    """Crude megacore detection (v7x has 2 TCs/chip); only used as a routing hint."""
    try:
        kind = jax.devices()[0].device_kind.lower()
        return 2 if ("v7" in kind or "7x" in kind) else 1
    except Exception:
        return 1


def _vmem_limit(needed_bytes, capacity_bytes):
    """Explicit scoped-VMEM limit: footprint + headroom, capped generation-aware
    at 75% of physical VMEM (<=48 MiB on v7x, <=96 MiB on v5e/v6e)."""
    return int(min(max(needed_bytes + (4 << 20), 16 << 20),
                   int(0.75 * capacity_bytes)))


def _invariant_spec(shape, index_map):
    """BlockSpec for a grid-invariant operand: request single buffering (the
    block never changes), falling back to the default double-buffered spec if
    this JAX version does not support pipeline_mode."""
    try:
        return pl.BlockSpec(shape, index_map, pipeline_mode=pl.Buffered(1))
    except Exception:
        return pl.BlockSpec(shape, index_map)


def _pick_fold(C, HW):
    """Channels-per-row fold factor k (k | C). Presenting x as (B, C//k, k*HW)
    makes rows lane-dense for 7x7 / 14x14 SE stages; same HBM bytes, contiguous."""
    if HW >= _FOLD_HW_THRESHOLD:
        return 1
    divisors = [k for k in range(2, C + 1) if C % k == 0]
    for k in divisors:                                # prefer >= 8 channel rows left
        if k * HW >= _FOLD_LANE_TARGET and (C // k) >= 8:
            return k
    for k in divisors:
        if k * HW >= _FOLD_LANE_TARGET:
            return k
    return 1                                          # tiny C*HW: not worth folding


def _pick_c_tile(cf, row, itemsize, target_block_bytes):
    """Largest multiple-of-8 divisor of cf whose (c_tile, row) block fits the target."""
    divs = [d for d in range(8, cf + 1, 8) if cf % d == 0]
    if not divs:
        return cf
    for d in sorted(divs, reverse=True):
        if d * row * itemsize <= target_block_bytes:
            return d
    # TODO(synk): tiny-cf / huge-row shapes would additionally need a row-tiled
    # accumulating squeeze; the smallest divisor may exceed the block target.
    return min(divs)


# ---------------------------------------------------------------------------
# In-kernel helpers
# ---------------------------------------------------------------------------

def _exact_dot_f32(a, b_bf16, parts=3):
    """a @ b using only native bf16 MXU passes with f32 accumulation.

    b must contain only bf16-exact values (here: 0/1 segment matrices).  f32 `a`
    is split into `parts` bf16 chunks (bf16x2/x3 ~= f32), so the result does not
    depend on the backend's f32 matmul precision setting."""
    if a.dtype == jnp.bfloat16:
        return jnp.dot(a, b_bf16, preferred_element_type=jnp.float32)
    a = a.astype(jnp.float32)
    out = None
    for i in range(parts):
        hi = a.astype(jnp.bfloat16)
        term = jnp.dot(hi, b_bf16, preferred_element_type=jnp.float32)
        out = term if out is None else out + term
        if i + 1 < parts:
            a = a - hi.astype(jnp.float32)
    return out


def _excite_gate(y, w1, w2):
    """FC -> ReLU -> FC -> sigmoid on (B, C) pooled means (the two 1x1 convs)."""
    h = jnp.maximum(jnp.dot(y, w1.T, preferred_element_type=jnp.float32), 0.0)
    return jax.nn.sigmoid(jnp.dot(h, w2.T, preferred_element_type=jnp.float32))


# ---------------------------------------------------------------------------
# Kernels
# ---------------------------------------------------------------------------

def _se_fused_kernel(x_ref, w1t_ref, w2t_ref, o_ref, *, inv_hw):
    # x_ref: (1, C, HW)   w1t_ref: (C, Cmid)   w2t_ref: (Cmid, C)
    x = x_ref[...]                                                  # native dtype

    # Squeeze: f32-accumulated mean over the spatial (lane) axis.
    y = jnp.sum(x, axis=-1, dtype=jnp.float32) * inv_hw             # (1, C) f32

    # Excite: FC -> ReLU -> FC -> sigmoid (weights pre-transposed, no in-kernel .T).
    h = jnp.maximum(
        jnp.dot(y, w1t_ref[...], preferred_element_type=jnp.float32), 0.0)
    g = jax.nn.sigmoid(
        jnp.dot(h, w2t_ref[...], preferred_element_type=jnp.float32))

    # Scale: per-channel gate applied in the native dtype.
    o_ref[...] = (x * g.astype(x.dtype)[..., None]).astype(o_ref.dtype)


def _se_squeeze_kernel(x_ref, y_ref, *, inv_hw):
    # x_ref: (1, c_tile, HW) -> y_ref: (1, c_tile, 1) f32 per-channel mean.
    y_ref[...] = jnp.sum(x_ref[...], axis=-1, keepdims=True,
                         dtype=jnp.float32) * inv_hw


def _se_squeeze_fold_kernel(x_ref, s_ref, y_ref, *, inv_hw):
    # x_ref: (1, c_tile, k*HW); s_ref: (k*HW, k) 0/1 bf16 segment matrix.
    # y_ref: (1, c_tile, k) f32 means of the k original channels in each row.
    y_ref[0] = _exact_dot_f32(x_ref[0], s_ref[...], parts=2) * inv_hw


def _se_scale_kernel(x_ref, g_ref, o_ref):
    # x_ref: (1, c_tile, HW), g_ref: (1, c_tile, 1) f32 gate.
    x = x_ref[...]
    o_ref[...] = (x * g_ref[...].astype(x.dtype)).astype(o_ref.dtype)


def _se_scale_fold_kernel(x_ref, g_ref, e_ref, o_ref):
    # x_ref: (1, c_tile, k*HW); g_ref: (1, c_tile, k) f32; e_ref: (k, k*HW) 0/1 bf16.
    x = x_ref[0]
    gate = _exact_dot_f32(g_ref[0], e_ref[...], parts=3)            # (c_tile, k*HW) f32
    o_ref[0] = (x * gate.astype(x.dtype)).astype(o_ref.dtype)


# ---------------------------------------------------------------------------
# pallas_call wrappers
# ---------------------------------------------------------------------------

def _se_fused(x_flat, w1_t, w2_t, vmem_needed, capacity):
    B, C, HW = x_flat.shape
    return pl.pallas_call(
        functools.partial(_se_fused_kernel, inv_hw=1.0 / HW),
        out_shape=jax.ShapeDtypeStruct((B, C, HW), x_flat.dtype),
        grid_spec=pltpu.PrefetchScalarGridSpec(
            num_scalar_prefetch=0,
            grid=(B,),
            in_specs=[
                pl.BlockSpec((1, C, HW), lambda b: (b, 0, 0)),
                _invariant_spec(w1_t.shape, lambda b: (0, 0)),
                _invariant_spec(w2_t.shape, lambda b: (0, 0)),
            ],
            out_specs=pl.BlockSpec((1, C, HW), lambda b: (b, 0, 0)),
        ),
        compiler_params=pltpu.CompilerParams(
            dimension_semantics=("parallel",),
            vmem_limit_bytes=_vmem_limit(vmem_needed, capacity),
        ),
    )(x_flat, w1_t, w2_t)


def _se_two_pass(x_flat, w1, w2, k, HW, capacity):
    """Two HBM passes: tiled (optionally channel-folded) squeeze -> tiny excite
    in plain XLA -> tiled scale.  1.5x traffic vs. the fused path, but no VMEM
    ceiling, lane-dense blocks for small-HW stages, and a (B, c_tiles) parallel
    grid for megacore."""
    B, cf, L = x_flat.shape                    # L == k * HW, cf == C // k
    C = cf * k
    dt = x_flat.dtype
    itemsize = jnp.dtype(dt).itemsize
    c_tile = _pick_c_tile(cf, L, itemsize, _TILED_BLOCK_BYTES)
    n_ct = cf // c_tile
    block_bytes = c_tile * L * itemsize
    gate_bytes = c_tile * k * 4
    fold_bytes = L * k * 2                     # bf16 segment matrices
    inv_hw = 1.0 / HW
    sem = ("parallel", "parallel")

    squeeze_vmem = _vmem_limit(2 * block_bytes + 2 * gate_bytes + 2 * fold_bytes,
                               capacity)
    scale_vmem = _vmem_limit(4 * block_bytes + 2 * gate_bytes + 2 * fold_bytes,
                             capacity)

    # ---- Phase 1: per-original-channel spatial means (f32). ----
    if k == 1:
        means = pl.pallas_call(
            functools.partial(_se_squeeze_kernel, inv_hw=inv_hw),
            out_shape=jax.ShapeDtypeStruct((B, cf, 1), jnp.float32),
            grid_spec=pltpu.PrefetchScalarGridSpec(
                num_scalar_prefetch=0, grid=(B, n_ct),
                in_specs=[pl.BlockSpec((1, c_tile, L), lambda b, ci: (b, ci, 0))],
                out_specs=pl.BlockSpec((1, c_tile, 1), lambda b, ci: (b, ci, 0)),
            ),
            compiler_params=pltpu.CompilerParams(
                dimension_semantics=sem, vmem_limit_bytes=squeeze_vmem),
        )(x_flat)
    else:
        # 0/1 segment matrices (exact in bf16): lane l belongs to channel l // HW.
        seg = (jnp.arange(L, dtype=jnp.int32)[:, None] // HW
               == jnp.arange(k, dtype=jnp.int32)[None, :])
        s_mat = seg.astype(jnp.bfloat16)               # (L, k)  segment-sum
        e_mat = seg.T.astype(jnp.bfloat16)             # (k, L)  gate expansion
        means = pl.pallas_call(
            functools.partial(_se_squeeze_fold_kernel, inv_hw=inv_hw),
            out_shape=jax.ShapeDtypeStruct((B, cf, k), jnp.float32),
            grid_spec=pltpu.PrefetchScalarGridSpec(
                num_scalar_prefetch=0, grid=(B, n_ct),
                in_specs=[
                    pl.BlockSpec((1, c_tile, L), lambda b, ci: (b, ci, 0)),
                    _invariant_spec((L, k), lambda b, ci: (0, 0)),
                ],
                out_specs=pl.BlockSpec((1, c_tile, k), lambda b, ci: (b, ci, 0)),
            ),
            compiler_params=pltpu.CompilerParams(
                dimension_semantics=sem, vmem_limit_bytes=squeeze_vmem),
        )(x_flat, s_mat)

    # ---- Excite in plain XLA: epilogue-sized (B, C) x (C, C//2) matmul pair. ----
    gates = _excite_gate(means.reshape(B, C), w1, w2)              # (B, C) f32

    # ---- Phase 2: stream x again and apply the gate. ----
    if k == 1:
        return pl.pallas_call(
            _se_scale_kernel,
            out_shape=jax.ShapeDtypeStruct((B, cf, L), dt),
            grid_spec=pltpu.PrefetchScalarGridSpec(
                num_scalar_prefetch=0, grid=(B, n_ct),
                in_specs=[
                    pl.BlockSpec((1, c_tile, L), lambda b, ci: (b, ci, 0)),
                    pl.BlockSpec((1, c_tile, 1), lambda b, ci: (b, ci, 0)),
                ],
                out_specs=pl.BlockSpec((1, c_tile, L), lambda b, ci: (b, ci, 0)),
            ),
            compiler_params=pltpu.CompilerParams(
                dimension_semantics=sem, vmem_limit_bytes=scale_vmem),
        )(x_flat, gates.reshape(B, cf, 1))

    return pl.pallas_call(
        _se_scale_fold_kernel,
        out_shape=jax.ShapeDtypeStruct((B, cf, L), dt),
        grid_spec=pltpu.PrefetchScalarGridSpec(
            num_scalar_prefetch=0, grid=(B, n_ct),
            in_specs=[
                pl.BlockSpec((1, c_tile, L), lambda b, ci: (b, ci, 0)),
                pl.BlockSpec((1, c_tile, k), lambda b, ci: (b, ci, 0)),
                _invariant_spec((k, L), lambda b, ci: (0, 0)),
            ],
            out_specs=pl.BlockSpec((1, c_tile, L), lambda b, ci: (b, ci, 0)),
        ),
        compiler_params=pltpu.CompilerParams(
            dimension_semantics=sem, vmem_limit_bytes=scale_vmem),
    )(x_flat, gates.reshape(B, cf, k), e_mat)


# ---------------------------------------------------------------------------
# Public entry point
# ---------------------------------------------------------------------------

def se_block(x, w1, w2, *, force_two_pass=False):
    """SEBlock forward. x: (B, C, H, W); w1: (C//2, C); w2: (C, C//2)."""
    B, C, H, W = x.shape
    HW = H * W
    itemsize = jnp.dtype(x.dtype).itemsize
    capacity = _vmem_capacity_bytes()

    # Lane folding: small-HW stages are presented as (B, C//k, k*HW) (a pure
    # metadata reshape of contiguous NCHW memory) so rows are lane-dense.
    k = _pick_fold(C, HW)
    x_flat = x.reshape(B, C // k, k * HW)

    slab_bytes = C * HW * itemsize
    w_bytes = (w1.size + w2.size) * jnp.dtype(w1.dtype).itemsize    # single-buffered
    fused_needed = 4 * slab_bytes + w_bytes      # 2x in + 2x out double-buffers + weights
    fused_budget = int(0.70 * capacity)          # ~45 MiB on v7x, ~90 MiB on v5e/v6e

    # v7x megacore: grid=(B,) cannot split across 2 TensorCores when B == 1, so
    # large single-image slabs use the (B, c_tiles) two-pass grid instead.
    megacore_reroute = (B == 1 and _tensorcores_per_chip() >= 2
                        and slab_bytes >= (8 << 20))

    if (k == 1 and not force_two_pass and not megacore_reroute
            and fused_needed <= fused_budget):
        # Extra w_bytes of VMEM headroom covers the double-buffered fallback if
        # pipeline_mode=Buffered(1) is unavailable in this JAX build.
        out_flat = _se_fused(x_flat, jnp.transpose(w1), jnp.transpose(w2),
                             fused_needed + w_bytes, capacity)
    else:
        out_flat = _se_two_pass(x_flat, w1, w2, k, HW, capacity)
    return out_flat.reshape(B, C, H, W)


def se_block_ref(x, w1, w2):
    """Pure-JAX reference mirroring the PyTorch module."""
    y = jnp.mean(x.astype(jnp.float32), axis=(2, 3))                # (B, C)
    g = _excite_gate(y, w1, w2)                                     # (B, C)
    return (x * g.astype(x.dtype)[:, :, None, None]).astype(x.dtype)


if __name__ == "__main__":
    key = jax.random.PRNGKey(0)
    kx, k1, k2, kx2, k3, k4 = jax.random.split(key, 6)

    # --- Shape 1: lane-dense HW (16x16) -> fused single-pass path. ---
    B, C, H, W = 2, 4, 16, 16
    x = jax.random.normal(kx, (B, C, H, W), dtype=jnp.float32)
    # nn.Conv2d(C, C//2, 1, bias=False).weight: (C//2, C, 1, 1) -> (C//2, C)
    w1 = jax.random.normal(k1, (C // 2, C), dtype=jnp.float32) * 0.1
    # nn.Conv2d(C//2, C, 1, bias=False).weight: (C, C//2, 1, 1) -> (C, C//2)
    w2 = jax.random.normal(k2, (C, C // 2), dtype=jnp.float32) * 0.1

    ref = se_block_ref(x, w1, w2)
    out = jax.block_until_ready(se_block(x, w1, w2))
    assert out.shape == (B, C, H, W)
    assert jnp.allclose(out, ref, atol=1e-5, rtol=1e-5)

    # Two-pass fallback (large-slab / megacore escape hatch) exercised explicitly.
    out_tp = jax.block_until_ready(se_block(x, w1, w2, force_two_pass=True))
    assert jnp.allclose(out_tp, ref, atol=1e-5, rtol=1e-5)

    # --- Shape 2: 7x7 stage (HW = 49) -> lane-folded two-pass path (k = 16). ---
    B2, C2, H2, W2 = 2, 128, 7, 7
    assert _pick_fold(C2, H2 * W2) == 16
    x2 = jax.random.normal(kx2, (B2, C2, H2, W2), dtype=jnp.float32)
    w1b = jax.random.normal(k3, (C2 // 2, C2), dtype=jnp.float32) * 0.05
    w2b = jax.random.normal(k4, (C2, C2 // 2), dtype=jnp.float32) * 0.05

    ref2 = se_block_ref(x2, w1b, w2b)
    out2 = jax.block_until_ready(se_block(x2, w1b, w2b))
    assert out2.shape == (B2, C2, H2, W2)
    assert jnp.allclose(out2, ref2, atol=1e-5, rtol=1e-5)

    print("KERNEL_OK")
</pallas_src>

<mosaic_0001>
module attributes {stable_mosaic.version = 11 : i64} {
  func.func @_se_fused_kernel(%arg0: i32, %arg1: memref<1x4x256xf32, #tpu.memory_space<vmem>>, %arg2: memref<4x2xf32, #tpu.memory_space<vmem>>, %arg3: memref<2x4xf32, #tpu.memory_space<vmem>>, %arg4: memref<1x4x256xf32, #tpu.memory_space<vmem>>) attributes {dimension_semantics = [#tpu.dimension_semantics<parallel>], iteration_bounds = array<i64: 2>, scalar_prefetch = 0 : i64, scratch_operands = 0 : i64, tpu.core_type = #tpu.core_type<tc>, window_params = [{transform_indices = @transform_0, window_bounds = array<i64: 1, 4, 256>}, {pipeline_mode = #tpu.pipeline_mode<synchronous>, transform_indices = @transform_1, window_bounds = array<i64: 4, 2>}, {pipeline_mode = #tpu.pipeline_mode<synchronous>, transform_indices = @transform_2, window_bounds = array<i64: 2, 4>}, {transform_indices = @transform_3, window_bounds = array<i64: 1, 4, 256>}]} {
    %c0 = arith.constant 0 : index
    %c0_0 = arith.constant 0 : index
    %c0_1 = arith.constant 0 : index
    %0 = vector.load %arg1[%c0, %c0_0, %c0_1] : memref<1x4x256xf32, #tpu.memory_space<vmem>>, vector<1x4x256xf32>
    %cst = arith.constant dense<0.000000e+00> : vector<1x4xf32>
    %1 = vector.multi_reduction <add>, %0, %cst [2] : vector<1x4x256xf32> to vector<1x4xf32>
    %cst_2 = arith.constant 3.906250e-03 : f32
    %2 = vector.broadcast %cst_2 : f32 to vector<1x4xf32>
    %3 = arith.mulf %1, %2 : vector<1x4xf32>
    %c0_3 = arith.constant 0 : index
    %c0_4 = arith.constant 0 : index
    %4 = vector.load %arg2[%c0_3, %c0_4] : memref<4x2xf32, #tpu.memory_space<vmem>>, vector<4x2xf32>
    %cst_5 = arith.constant dense<0.000000e+00> : vector<1x2xf32>
    %5 = tpu.matmul %3, %4, %cst_5 {dimension_numbers = #tpu.dot_dimension_numbers<[1], [0], [0], [1], [0, 0, 1, 1], [], []>} : vector<1x4xf32>, vector<4x2xf32>, vector<1x2xf32> -> vector<1x2xf32>
    %cst_6 = arith.constant 0.000000e+00 : f32
    %6 = vector.broadcast %cst_6 : f32 to vector<1x2xf32>
    %7 = arith.maximumf %5, %6 : vector<1x2xf32>
    %c0_7 = arith.constant 0 : index
    %c0_8 = arith.constant 0 : index
    %8 = vector.load %arg3[%c0_7, %c0_8] : memref<2x4xf32, #tpu.memory_space<vmem>>, vector<2x4xf32>
    %cst_9 = arith.constant dense<0.000000e+00> : vector<1x4xf32>
    %9 = tpu.matmul %7, %8, %cst_9 {dimension_numbers = #tpu.dot_dimension_numbers<[1], [0], [0], [1], [0, 0, 1, 1], [], []>} : vector<1x2xf32>, vector<2x4xf32>, vector<1x4xf32> -> vector<1x4xf32>
    %10 = arith.negf %9 : vector<1x4xf32>
    %11 = math.exp %10 : vector<1x4xf32>
    %cst_10 = arith.constant 1.000000e+00 : f32
    %12 = vector.broadcast %cst_10 : f32 to vector<1x4xf32>
    %13 = arith.addf %12, %11 : vector<1x4xf32>
    %14 = arith.divf %12, %13 : vector<1x4xf32>
    %15 = vector.shape_cast %14 : vector<1x4xf32> to vector<1x4x1xf32>
    %16 = vector.broadcast %15 : vector<1x4x1xf32> to vector<1x4x256xf32>
    %17 = arith.mulf %0, %16 : vector<1x4x256xf32>
    %c0_11 = arith.constant 0 : index
    %c0_12 = arith.constant 0 : index
    %c0_13 = arith.constant 0 : index
    %18 = vector.load %arg4[%c0_11, %c0_12, %c0_13] : memref<1x4x256xf32, #tpu.memory_space<vmem>>, vector<1x4x256xf32>
    tpu.vector_store %arg4[%c0_11, %c0_12, %c0_13], %17 {strides = array<i32>} : memref<1x4x256xf32, #tpu.memory_space<vmem>>, vector<1x4x256xf32>,
    return
  }
  func.func @transform_0(%arg0: i32) -> (i32, i32, i32) {
    %c0_i32 = arith.constant 0 : i32
    %c0_i32_0 = arith.constant 0 : i32
    %c0_i32_1 = arith.constant 0 : i32
    return %arg0, %c0_i32, %c0_i32_0 : i32, i32, i32
  }
  func.func @transform_1(%arg0: i32) -> (i32, i32) {
    %c0_i32 = arith.constant 0 : i32
    %c0_i32_0 = arith.constant 0 : i32
    %c0_i32_1 = arith.constant 0 : i32
    return %c0_i32, %c0_i32_0 : i32, i32
  }
  func.func @transform_2(%arg0: i32) -> (i32, i32) {
    %c0_i32 = arith.constant 0 : i32
    %c0_i32_0 = arith.constant 0 : i32
    %c0_i32_1 = arith.constant 0 : i32
    return %c0_i32, %c0_i32_0 : i32, i32
  }
  func.func @transform_3(%arg0: i32) -> (i32, i32, i32) {
    %c0_i32 = arith.constant 0 : i32
    %c0_i32_0 = arith.constant 0 : i32
    %c0_i32_1 = arith.constant 0 : i32
    return %arg0, %c0_i32, %c0_i32_0 : i32, i32, i32
  }
}

</mosaic_0001>

<bundles_post_ra>
// kernel: tpu_custom_call.1
= control target key start
LH: loop header
LB: loop body
LE: loop exit
PB: predicated region body
PF: predicated region fallthrough
CT: control target
= control target key end

     0   :  { %8 = vsyncpa [#allocation3], 0  ;;  %s854_s0 = inlined_call_operand.hbm [shape: f32[2,4,256], index: 0, kind: input, shape index: {}]   ;;  %s855_s1 = inlined_call_operand.vmem [shape: f32[4,2], index: 1, kind: input, shape index: {}]   ;;  %s856_s2 = inlined_call_operand.vmem [shape: f32[2,4], index: 2, kind: input, shape index: {}]   ;;  %s857_s3 = inlined_call_operand.hbm [shape: f32[2,4,256], index: 3, kind: output, shape index: {}]  }
   0x1   :  { %10 = vsyncpa [#allocation3 + $0x1], 0 }
   0x2   :  { %11 = vsyncpa [#allocation4], 0 }
   0x3   :  { %13 = vsyncpa [#allocation4 + $0x1], 0  ;;  %s683_s12 = smov 0   ;;  %s685_s13 = smov 0  }
   0x4   :  { %s687_s14 = smov 0   ;;  %s689_s15 = smov 0  }
   0x5 LB: > { %s704_s16 = sadd.s32 4294967295, %s656_s15   ;;  %s471_s17 = sadd.s32 4294967294, %s656_s15   ;;  %s656_s15 = sphi %s689_s15, %s872_s15   ;;  %s652_s14 = sphi %s687_s14, %s871_s14   ;;  %s648_s13 = sphi %s685_s13, %s870_s13   ;;  %s644_s12 = sphi %s683_s12, %s869_s12  }
   0x6   : > { %s708_s18 = sadd.s32 1, %s656_s15   ;;  %s26_s19 = sadd.s32 1, %s652_s14 }
   0x7   : > { %s23_s20 = ssub.s32 %s656_s15, %s708_s18  ;;  %p33_p0 = scmp.ne.s32.totalorder %s652_s14, %s648_s13 }
   0x8   : > { %p24_p1 = scmp.eq.s32.totalorder %s23_s20, 0  ;;  %p34_p2 = scmp.eq.s32.totalorder %s656_s15, 0 }
   0x9   : > { %p39_p3 = scmp.ne.s32.totalorder %s648_s13, %s644_s12  ;;  %p40_p4 = scmp.eq.s32.totalorder %s704_s16, 0 }
   0xa   : > { %s720_s21 = scalar_select %p24_p1, %s652_s14, %s26_s19  }
   0xb   : > { %p722_p5 = por %p34_p2, %p33_p0  ;;  %p726_p6 = por %p40_p4, %p39_p3 }
   0xc   : > { %p105_p7 = scmp.eq.s32.totalorder %s704_s16, 1  ;;  %p111_p8 = scmp.eq.s32.totalorder %s471_s17, 1 }
   0xd   : > { %p518_p10 = scmp.lt.s32.totalorder %s656_s15, 2  ;;  %s137_s26 = sand.u32 1, %s652_s14  }
   0xe   : > { %p733_p11 = por %p105_p7, %p33_p0  ;;  %p737_p12 = por %p111_p8, %p39_p3 }
   0xf   : > { %s490_s27 = sshll.u32 %s656_s15, 7  ;;  %s474_s28 = sshll.u32 %s137_s26, 3 }
  0x10   : > { %s861_s24 = scalar_select %p733_p11, 1, 0 }
  0x11   : > { %s862_s25 = scalar_select %p737_p12, 1, 0 }
  0x12   : > { %s746_s4 = scalar_lea.hbm %s854_s0, %s490_s27  ;;  %s141_s5 = scalar_lea.vmem [#allocation2], %s474_s28 }
  0x13   : > { %s149_s6 = sshll.u32 %s141_s5, 4  ;;  %p750_p13 = pnand %p518_p10, %p722_p5  ;;  %s754_s6 = int_to_ptr.vmem [resolvable:$true] %s149_s6 }
  0x14   : > { %s138_s8 = scalar_lea.sflag [#allocation3], %s137_s26  ;;  %s560_s9 = scalar_lea.hbm %s746_s4, 128 }
  0x15   : > { %p561_p2 = scmp.ne.s32.totalorder %s746_s4, %s560_s9  ;;  %p562_p3 = pneg %p750_p13 }
  0x16   : > { %s565_s17 = scalar_lea.hbm %s854_s0, 256  ;;  %p566_p5 = scmp.lt.u32.totalorder %s746_s4, %s854_s0 }
  0x17   : > { %p563_p4 = pnand %p562_p3, %p561_p2  ;;  %p567_p8 = scmp.lt.u32.totalorder %s565_s17, %s560_s9 }
  0x18   : > { %p569_p9 = scmp.lt.u32.totalorder %s560_s9, %s746_s4 }
  0x19   : > { %p564_p7 = pneg %p563_p4  ;;  %p568_p10 = por %p567_p8, %p566_p5 }
  0x1b   : > { %p570_p0 = por %p569_p9, %p568_p10 }
  0x1d   : > { %p571_p1 = pnand %p570_p0, %p564_p7 }
  0x1f   : > { %574 = shalt.err (!%p571_p1)
}
  0x20   : > { %s575_s22 = scalar_lea.vmem %s754_s6, 128  ;;  %s658_s26 = smov [#allocation2]  }
  0x21   : > { %p576_p2 = scmp.ne.s32.totalorder %s754_s6, %s575_s22  ;;  %s580_s27 = sshll.u32 %s658_s26, 4  ;;  %s581_s27 = int_to_ptr.vmem [resolvable:$false] %s580_s27 }
  0x22   : > { %s582_s28 = scalar_lea.vmem %s581_s27, 256  ;;  %p583_p11 = scmp.lt.s32.totalorder %s754_s6, %s581_s27 }
  0x23   : > { %p578_p4 = pnand %p576_p2, %p562_p3  ;;  %p584_p5 = scmp.lt.s32.totalorder %s582_s28, %s575_s22 }
  0x25   : > { %p579_p12 = pneg %p578_p4  ;;  %p585_p8 = por %p584_p5, %p583_p11 }
  0x27   : > { %p586_p9 = pnand %p585_p8, %p579_p12 }
  0x29   : > { %589 = shalt.err (!%p586_p9)
}
  0x2a   : > { %513 = dma.hbm_to_vmem [thread:$0]  (!%p750_p13), %s746_s4, 128, %s754_s6, %s138_s8  }
  0x2b   : > { %p864_p0 = scmp.lt.s32.totalorder %s656_s15, 3  ;;  %p865_p1 = scmp.ge.s32.totalorder %s656_s15, 1 }
  0x2d   : > { %p155_p3 = pnand %p865_p1, %p864_p0 }
  0x2e   : > { %s788_s29 = sand.u32 (!%p155_p3), 1, %s648_s13  }
  0x2f   : > { %158 = sbr.rel (%p155_p3) target bundleno = 794 (0x31a), region = 32  ;;  %s478_s30 = sshll.u32 (!%p155_p3), %s788_s29, 3 }
  0x30   : > { %s161_s5 = scalar_lea.sflag (!%p155_p3), [#allocation3], %s788_s29  ;;  %s164_s7 = scalar_lea.vmem (!%p155_p3), [#allocation2], %s478_s30 }
  0x36   : > { %635 = dma.done.wait (%p726_p6), %s161_s5, 128  }
  0x37   : > { %637 = vsyncadd (%p726_p6), %s161_s5, 4294967168  ;;  %vm191_vm0 = vcmask 1043456   ;;  %v187_v0 = vld [vmem:[%s164_s7] sm:$0xff]  ;;  %v659_v5 = vmov 0.0   ;;  %vm660_vm1 = vmmov 0   ;;  %v200_v7 = vlaneseq  ;;  %s491_s9 = sshll.u32 %s704_s16, 7 }
  0x38   : > { %v189_v1 = vcombine.high %v187_v0, %v187_v0  ;;  %v192_v2 = vsel %vm191_vm0, %v187_v0, 0.0  ;;  %496 = vmatprep.subr.mxu0 %v659_v5  ;;  %v198_v6 = vld [vmem:[%s855_s1] sm:$0xf]  ;;  %501 = vmatprep.subr.mxu1 %v659_v5  ;;  %vm206_vm2 = vcmask 31744   ;;  %vm288_vm3 = vcmask 1041408   ;;  %s186_s10 = scalar_lea.vmem [#allocation5], %s478_s30  ;;  %s810_s20 = scalar_lea.hbm %s857_s3, %s491_s9 }
  0x39   : > { %497 = vmatpush3.msk.msra.mxu0 %vm191_vm0, %v198_v6  ;;  %498 = vmatprep.mubr.msk.f32.mxu0 %vm660_vm1, %v659_v5  ;;  %v201_v8 = vand.u32 127, %v200_v7  ;;  %v203_v9 = vshrl.u32 %v200_v7, 7  ;;  %v283_v14 = vld [vmem:[%s856_s2] sm:$0x3]  ;;  %vm284_vm4 = vcmask 15360   ;;  %s401_s11 = sshll.u32 %s186_s10, 4  ;;  %s812_s11 = int_to_ptr.vmem [resolvable:$true] %s401_s11 }
  0x3a   : > { %v193_v3 = vsel %vm191_vm0, %v189_v1, 0.0  ;;  %503 = vmatprep.mubr.msk.f32.mxu1 %vm660_vm1, %v659_v5  ;;  %502 = vmatpush3.msk.msra.mxu1 %vm288_vm3, %v283_v14  ;;  %v661_v26 = vmov 839922192   ;;  %s387_s22 = scalar_lea.sflag [#allocation4], %s788_s29  ;;  %s590_s26 = scalar_lea.vmem %s812_s11, 128 }
  0x3b   : > { %v194_v4 = vadd.f32 %v193_v3, %v192_v2  ;;  %v204_v10 = vsub.s32 %v201_v8, %v203_v9  ;;  %v370_v23 = vsub.s32 0, %v203_v9  ;;  %v377_v27 = vunpack.c.l.s4 %v661_v26  ;;  %p591_p6 = scmp.ne.s32.totalorder %s812_s11, %s590_s26  ;;  %p866_p11 = scmp.ne.s32.totalorder %s861_s24, 0 }
  0x3c   : > { %s662_s16 = smov [#allocation5]  }
  0x3d   : > { %195 = vadd.xlane.f32.xlu0 %v194_v4  ;;  %v378_v28 = vunpack.c.0.s8 %v377_v27  ;;  %p592_p12 = pnand %p591_p6, %p866_p11  ;;  %s594_s27 = sshll.u32 %s662_s16, 4  ;;  %s595_s27 = int_to_ptr.vmem [resolvable:$false] %s594_s27 }
  0x3e   : > { %s596_s28 = scalar_lea.vmem %s595_s27, 256  ;;  %p597_p7 = scmp.lt.s32.totalorder %s812_s11, %s595_s27 }
  0x3f   : > { %v381_v29 = vsub.s32 %v378_v28, %v203_v9  ;;  %p593_p13 = pneg %p592_p12  ;;  %p598_p10 = scmp.lt.s32.totalorder %s596_s28, %s590_s26 }
  0x41   : > { %p599_p2 = por %p598_p10, %p597_p7 }
  0x43   : > { %p600_p4 = pnand %p599_p2, %p593_p13 }
  0xca   : > { %v196_v11 = vpop.xlane.xlu0 %195 }
  0xcb   : > { %v197_v12 = vmul.f32 0.00390625, %v196_v11 }
  0xcd   : > { %v205_v13 = vrot.slane %v197_v12, %v204_v10 }
  0xcf   : > { %499 = vmatmul.mubr.msk.f32.vlgmr.msra.gmra.mrb[0].mxu0 %vm206_vm2, %v205_v13 }
 0x1a2   : > { %v278_v15 = vpop.f32.mrb[0].mxu0 }
 0x1a3   : > { %v282_v16 = vmax.f32 %v278_v15, 0.0  ;;  %v500_v17 = vpop.f32.mrb[1].mxu0 }
 0x1a5   : > { %504 = vmatmul.mubr.msk.f32.vlgmr.msra.gmra.mrb[0].mxu1 %vm284_vm4, %v282_v16 }
 0x278   : > { %v358_v18 = vpop.f32.mrb[0].mxu1 }
 0x279   : > { %v484_v19 = vmul.f32 -1.442695, %v358_v18  ;;  %v505_v20 = vpop.f32.mrb[1].mxu1 }
 0x27b   : > { %556 = vpow2.f32 %v484_v19 }
 0x285   : > { %v557_v21 = vpop.eup %556 }
 0x286   : > { %v365_v22 = vadd.f32 1.0, %v557_v21 }
 0x288   : > { %558 = vrcp.f32 %v365_v22 }
 0x292   : > { %v559_v24 = vpop.eup %558 }
 0x293   : > { %v371_v25 = vrot.slane %v559_v24, %v370_v23 }
 0x295   : > { %373 = vbcast.lane.b32.xlu0 %v371_v25, 256 }
 0x307   : > { %v374_v30 = vpop.permute.xlu0 %373 }
 0x308   : > { %v382_v31 = vrot.slane %v374_v30, %v381_v29 }
 0x30a   : > { %v384_v32 = vmul.f32 %v382_v31, %v187_v0 }
 0x30c   : > { %385 = vst [vmem:[%s186_s10] sm:$0xff] %v384_v32 }
 0x30d   : > { %603 = shalt.err (!%p600_p4)
}
 0x30e   : > { %s604_s29 = scalar_lea.hbm %s810_s20, 128  ;;  %s608_s7 = scalar_lea.hbm %s857_s3, 256 }
 0x30f   : > { %p605_p5 = scmp.ne.s32.totalorder %s810_s20, %s604_s29  ;;  %p609_p0 = scmp.lt.u32.totalorder %s810_s20, %s857_s3 }
 0x310   : > { %p610_p1 = scmp.lt.u32.totalorder %s608_s7, %s604_s29  ;;  %p612_p6 = scmp.lt.u32.totalorder %s604_s29, %s810_s20 }
 0x311   : > { %p606_p8 = pnand %p605_p5, %p866_p11 }
 0x312   : > { %p611_p3 = por %p610_p1, %p609_p0 }
 0x313   : > { %p607_p9 = pneg %p606_p8 }
 0x314   : > { %p613_p12 = por %p612_p6, %p611_p3 }
 0x316   : > { %p614_p13 = pnand %p613_p12, %p607_p9 }
 0x318   : > { %617 = shalt.err (!%p614_p13)
}
 0x319   : > { %508 = dma.vmem_to_hbm [thread:$0]  (%p866_p11), %s812_s11, 128, %s810_s20, %s387_s22  }
 0x31a PF: > { %s413_s23 = sand.u32 1, %s644_s12   ;;  %p867_p7 = scmp.ne.s32.totalorder %s862_s25, 0 }
 0x31b   : > { %p868_p10 = scmp.ge.s32.totalorder %s656_s15, 2  ;;  %s414_s8 = scalar_lea.sflag [#allocation4], %s413_s23 }
 0x31d   : > { %p515_p2 = pnand %p868_p10, %p867_p7 }
 0x31f   : > { %639 = dma.done.wait (!%p515_p2), %s414_s8, 128  }
 0x320   : > { %641 = vsyncadd (!%p515_p2), %s414_s8, 4294967168  ;;  %p16_p4 = scmp.ge.s32.totalorder %s708_s18, 4   ;;  %s869_s12 = smov %s648_s13 }
 0x321   : > { %s870_s13 = smov %s652_s14  ;;  %s871_s14 = smov %s720_s21 }
 0x322   : > { %s872_s15 = smov %s708_s18  ;;  %18 = sbr.rel (!%p16_p4) target bundleno = 5 (0x5), region = 77 }
 0x329   :  { %419 = vsyncpa [#allocation3], 1 }
 0x32a   :  { %421 = vsyncpa [#allocation3 + $0x1], 1 }
 0x32b   :  { %422 = vsyncpa [#allocation4], 1 }
 0x32c   :  { %424 = vsyncpa [#allocation4 + $0x1], 1 }

</bundles_post_ra>
